<compile_context>
chip_gen: v7x
topology: tpu7x:2x2x1
jax: 0.10.0
libtpu: 0.0.40
codegen_flags: <defaults>
</compile_context>

<pallas_src>
import functools

import jax
import jax.numpy as jnp
from jax import lax
from jax.experimental import pallas as pl
from jax.experimental.pallas import tpu as pltpu


def _round_up(n, m):
    return (n + m - 1) // m * m


def _cdiv(a, b):
    return (a + b - 1) // b


def _largest_divisor_leq(n, target):
    target = max(1, min(n, target))
    for d in range(target, 0, -1):
        if n % d == 0:
            return d
    return 1


def _device_info():
    """(physical VMEM bytes per core, #TensorCores per chip) with safe fallbacks."""
    vmem = 64 << 20            # conservative default (v7x per-TC size)
    num_tc = 1
    try:
        info = pltpu.get_tpu_info()
        vmem = int(getattr(info, "vmem_capacity_bytes", vmem)) or vmem
    except Exception:          # query unavailable -> keep conservative default
        pass
    try:
        kind = jax.devices()[0].device_kind.lower()
        if ("v4" in kind) or ("v5p" in kind) or ("v7" in kind):
            num_tc = 2         # megacore / dual-TensorCore chips
    except Exception:
        pass
    return vmem, num_tc


def _sub_slice(th):
    """Lane width of the H sub-slice the recurrence iterates over.

    <=512 lanes keeps the per-step vreg working set bounded; >=2 sub-slices
    lets the next slice's projection matmul hide behind this slice's serial
    recurrence."""
    if th % 128 == 0:
        for d in (512, 384, 256, 128):
            if d < th and th % d == 0:
                return d
        return th              # th == 128
    if th > 512:
        return _largest_divisor_leq(th, 512)
    return th


def _vmem_need(ts, th, hs, b_pad, in_feat, csize, osize):
    rows = ts * b_pad
    return (2 * rows * in_feat * csize        # x chunk (double-buffered)
            + 2 * rows * th * osize           # y chunk (double-buffered)
            + 2 * in_feat * th * csize        # weight tile
            + 4 * 8 * th * 4                  # bias / recurrent-weight tiles
            + b_pad * th * 4                  # h carry scratch
            + 2 * rows * hs * 4)              # lin ping-pong scratches


def _plan_tiling(seq_len, b_pad, in_feat, hidden, csize, osize):
    """Pick (th, ts, hs, g, vmem_cap): H tile, seq chunk, H sub-slice, unroll."""
    vmem_cap, num_tc = _device_info()
    budget = int(vmem_cap * 0.7)              # headroom for compiler scratch
    g = 8                                     # timesteps per unrolled group

    # H-tile candidates, best first: full hidden means x is read from HBM
    # exactly once; hidden/2 is preferred on dual-TC chips so the 'parallel'
    # H grid axis actually splits across cores.
    cands = []
    if num_tc >= 2 and hidden % 256 == 0:
        cands.append(hidden // 2)
    if hidden not in cands:
        cands.append(hidden)
    for d in (2048, 1024, 512, 256, 128):
        if d < hidden and hidden % d == 0 and d not in cands:
            cands.append(d)

    ts_seq = g * _cdiv(seq_len, g)            # whole (padded) sequence at once
    ts_cap = max(g, min(ts_seq, max(g, (2048 // b_pad) // g * g)))
    for th in cands:
        hs = _sub_slice(th)
        ts = ts_cap
        while ts >= g:
            if _vmem_need(ts, th, hs, b_pad, in_feat, csize, osize) <= budget:
                return th, ts, hs, g, vmem_cap
            ts -= g
    th = cands[-1]
    return th, g, _sub_slice(th), g, vmem_cap


def indrnn_layer_kernel(x_ref, w_ref, b_ref, u_ref, y_ref, lin_a, lin_b, h_ref,
                        *, ts, b_pad, g, hs, use_tanh):
    """One IndRNN layer, one (H-tile, seq-chunk) grid cell.

    x_ref : (TS*Bp, I)   flattened time-major input chunk (compute dtype)
    w_ref : (I, TH)      Conv1d(k=1) weight tile, pre-transposed
    b_ref : (1, TH)      bias tile (f32)
    u_ref : (1, TH)      element-wise recurrent weight tile (f32)
    y_ref : (TS*Bp, TH)  hidden states for this chunk / H-tile
    lin_a/lin_b : (TS*Bp, HS) f32 ping-pong scratch for the input projection
    h_ref : (Bp, TH)     f32 carry, persists across the seq-chunk grid axis
    """
    s = pl.program_id(1)
    th = u_ref.shape[1]
    n_sub = th // hs
    ng = ts // g
    group_rows = g * b_pad
    pairs, g_odd = divmod(g, 2)

    # h0 is a zeros buffer in the module; reset at the start of every sweep.
    @pl.when(s == 0)
    def _():
        h_ref[...] = jnp.zeros_like(h_ref)

    act = jnp.tanh if use_tanh else (lambda v: jnp.maximum(v, 0.0))
    x_val = x_ref[...]                         # chunk stays resident in VMEM

    def project(j, dst):
        # Whole-chunk input projection for H sub-slice j: one tall MXU matmul
        # with f32 accumulation. Bias is folded into the recurrence step so no
        # extra read+write pass over the lin scratch is needed.
        dst[...] = jnp.dot(x_val, w_ref[:, j * hs:(j + 1) * hs],
                           preferred_element_type=jnp.float32)

    def recur(j, src):
        col = j * hs
        # Hoist broadcasts out of the timestep loop (no CSE of broadcast_in_dim).
        u_b = jnp.broadcast_to(u_ref[:, col:col + hs], (b_pad, hs))
        b_b = jnp.broadcast_to(b_ref[:, col:col + hs], (b_pad, hs))

        def group(gi, h):
            row0 = pl.multiple_of(gi * group_rows, group_rows)
            for p in range(pairs):             # unrolled: coalesced 2-step stores
                r = row0 + 2 * p * b_pad
                h1 = act(src[pl.ds(r, b_pad), :] + (u_b * h + b_b))
                h2 = act(src[pl.ds(r + b_pad, b_pad), :] + (u_b * h1 + b_b))
                y_ref[pl.ds(r, 2 * b_pad), col:col + hs] = jnp.concatenate(
                    [h1, h2], axis=0).astype(y_ref.dtype)
                h = h2
            if g_odd:                          # only taken if g is odd
                r = row0 + (g - 1) * b_pad
                h = act(src[pl.ds(r, b_pad), :] + (u_b * h + b_b))
                y_ref[pl.ds(r, b_pad), col:col + hs] = h.astype(y_ref.dtype)
            return h

        h_fin = lax.fori_loop(0, ng, group, h_ref[:, col:col + hs])
        h_ref[:, col:col + hs] = h_fin

    # Software pipeline over H sub-slices: the MXU projection of slice j+1 is
    # written into the other ping-pong buffer before the serial VPU recurrence
    # of slice j, so the vmatmul work co-issues with the VALU/store recurrence.
    project(0, lin_a)
    for j in range(n_sub):
        cur, nxt = (lin_a, lin_b) if j % 2 == 0 else (lin_b, lin_a)
        if j + 1 < n_sub:
            project(j + 1, nxt)
        recur(j, cur)


def _indrnn_layer(x2, w, b, u, *, ts, th, hs, g, b_pad, vmem_cap,
                  compute_dtype, out_dtype, nonlinearity):
    """x2: (seq_pad*b_pad, in_feat) flattened time-major input.
    Returns y2: (seq_pad*b_pad, hidden) in out_dtype."""
    rows, in_feat = x2.shape
    hidden = w.shape[0]
    nh = hidden // th
    chunk_rows = ts * b_pad
    ns = rows // chunk_rows

    csize = jnp.dtype(compute_dtype).itemsize
    osize = jnp.dtype(out_dtype).itemsize
    need = _vmem_need(ts, th, hs, b_pad, in_feat, csize, osize)
    # Generation-aware scoped-VMEM limit (no hard 40 MiB cap).
    vmem_limit = int(min(0.85 * vmem_cap, max(need + (6 << 20), 32 << 20)))

    cost = pl.CostEstimate(
        flops=2 * rows * in_feat * hidden + 4 * rows * hidden,
        transcendentals=rows * hidden if nonlinearity == "tanh" else 0,
        bytes_accessed=(nh * rows * in_feat * csize
                        + in_feat * hidden * csize
                        + 2 * hidden * 4
                        + rows * hidden * osize),
    )

    kernel = functools.partial(
        indrnn_layer_kernel, ts=ts, b_pad=b_pad, g=g, hs=hs,
        use_tanh=(nonlinearity == "tanh"))

    return pl.pallas_call(
        kernel,
        out_shape=jax.ShapeDtypeStruct((rows, hidden), out_dtype),
        grid_spec=pltpu.PrefetchScalarGridSpec(
            num_scalar_prefetch=0,
            grid=(nh, ns),                     # H tiles outer, seq chunks inner
            in_specs=[
                pl.BlockSpec((chunk_rows, in_feat), lambda h, s: (s, 0)),
                pl.BlockSpec((in_feat, th), lambda h, s: (0, h)),
                pl.BlockSpec((1, th), lambda h, s: (0, h)),
                pl.BlockSpec((1, th), lambda h, s: (0, h)),
            ],
            out_specs=pl.BlockSpec((chunk_rows, th), lambda h, s: (s, h)),
            scratch_shapes=[
                pltpu.VMEM((chunk_rows, hs), jnp.float32),   # lin ping
                pltpu.VMEM((chunk_rows, hs), jnp.float32),   # lin pong
                pltpu.VMEM((b_pad, th), jnp.float32),        # h carry
            ],
        ),
        compiler_params=pltpu.CompilerParams(
            dimension_semantics=("parallel", "arbitrary"),
            vmem_limit_bytes=vmem_limit,
        ),
        cost_estimate=cost,
    )(
        x2.astype(compute_dtype),
        w.T.astype(compute_dtype),                     # (I, H) for the MXU
        b.reshape(1, hidden).astype(jnp.float32),
        u.reshape(1, hidden).astype(jnp.float32),
    )


@functools.partial(jax.jit, static_argnames=("nonlinearity", "compute_dtype"))
def indrnn_v2_forward(x, weights, biases, recurrents, nonlinearity="relu",
                      compute_dtype=jnp.bfloat16):
    """x: (seq, batch, input_size). Returns (output, hiddens) like the module."""
    if nonlinearity not in ("relu", "tanh"):
        raise ValueError("Unknown nonlinearity: {}".format(nonlinearity))
    seq_len, batch, in_feat = x.shape
    hidden = weights[0].shape[0]
    num_layers = len(weights)

    b_pad = _round_up(batch, 8)                  # sublane-align the (B, H) slabs
    csize = jnp.dtype(compute_dtype).itemsize
    th, ts, hs, g, vmem_cap = _plan_tiling(
        seq_len, b_pad, max(in_feat, hidden), hidden, csize, osize=4)
    seq_pad = _round_up(seq_len, ts)             # avoids pathological ts=1 tiling

    if (seq_pad, b_pad) != (seq_len, batch):
        x = jnp.pad(x, ((0, seq_pad - seq_len), (0, b_pad - batch), (0, 0)))
    cur = x.reshape(seq_pad * b_pad, in_feat)    # lane-dense 2-D layout

    last_row = (seq_len - 1) * b_pad             # rows of the last *valid* step
    hiddens = []
    for li, (w, b, u) in enumerate(zip(weights, biases, recurrents)):
        last = li == num_layers - 1
        # TODO(synk): fusing consecutive layers per seq-chunk in one pallas_call
        # would remove the interior HBM round-trips (biggest win on v5e);
        # interior activations are kept in bf16 instead to halve that traffic.
        cur = _indrnn_layer(
            cur, w, b, u, ts=ts, th=th, hs=hs, g=g, b_pad=b_pad,
            vmem_cap=vmem_cap, compute_dtype=compute_dtype,
            out_dtype=jnp.float32 if last else compute_dtype,
            nonlinearity=nonlinearity)
        # h_n of this layer = y at the last valid timestep; padded timesteps sit
        # after the valid ones so they never contaminate it.
        hiddens.append(cur[last_row:last_row + batch].astype(jnp.float32))

    out = cur.reshape(seq_pad, b_pad, hidden)[:seq_len, :batch]
    h_n = jnp.concatenate(hiddens, axis=-1)      # (batch, num_layers*hidden)
    # batch_first=False -> output stays (seq, batch, hidden); the module's
    # .squeeze(2) is a no-op for hidden_size > 1.
    return out, h_n


def indrnn_v2_reference(x, weights, biases, recurrents):
    """Pure-JAX fp32 reference mirroring the PyTorch forward exactly."""
    hiddens = []
    for w, b, u in zip(weights, biases, recurrents):
        lin = jnp.einsum("sbi,hi->sbh", x, w) + b[None, None, :]

        def step(hx, lin_t):
            h_new = jax.nn.relu(lin_t + u[None, :] * hx)
            return h_new, h_new

        hx0 = jnp.zeros((x.shape[1], w.shape[0]), jnp.float32)
        hn, ys = lax.scan(step, hx0, lin)
        x = ys
        hiddens.append(hn)
    return x, jnp.concatenate(hiddens, axis=-1)


def init_params(key, input_size, hidden_size, num_layers):
    """Deterministic parameter init matching the module's __init__ defaults."""
    weights, biases, recurrents = [], [], []
    for i in range(num_layers):
        in_size = input_size if i == 0 else hidden_size
        key, sub = jax.random.split(key)
        # torch.nn.init.normal_(hidden.weight, 0, 0.01); weight (H, in, 1) -> (H, in)
        w = 0.01 * jax.random.normal(sub, (hidden_size, in_size), jnp.float32)
        b = jnp.zeros((hidden_size,), jnp.float32)   # constant_(bias, 0)
        u = jnp.ones((hidden_size,), jnp.float32)    # constant_(recurrent, 1)
        weights.append(w)
        biases.append(b)
        recurrents.append(u)
    return weights, biases, recurrents


if __name__ == "__main__":
    def _check(seq_len, batch, input_size, hidden_size, num_layers,
               atol32, rtol32, atol16, rtol16):
        key = jax.random.PRNGKey(0)
        key, kx = jax.random.split(key)
        x = jax.random.normal(kx, (seq_len, batch, input_size), jnp.float32)
        weights, biases, recurrents = init_params(key, input_size, hidden_size,
                                                  num_layers)
        ref_out, ref_hn = indrnn_v2_reference(x, weights, biases, recurrents)

        # fp32 compute path.
        out32, hn32 = indrnn_v2_forward(x, weights, biases, recurrents,
                                        compute_dtype=jnp.float32)
        out32, hn32 = jax.block_until_ready((out32, hn32))
        assert out32.shape == (seq_len, batch, hidden_size), out32.shape
        assert hn32.shape == (batch, num_layers * hidden_size), hn32.shape
        assert jnp.allclose(out32, ref_out, atol=atol32, rtol=rtol32)
        assert jnp.allclose(hn32, ref_hn, atol=atol32, rtol=rtol32)

        # bf16 MXU path (default): looser tolerance (bf16 inputs/activations,
        # f32 accumulation; error compounds across timesteps and layers).
        out16, hn16 = indrnn_v2_forward(x, weights, biases, recurrents)
        out16, hn16 = jax.block_until_ready((out16, hn16))
        assert out16.shape == (seq_len, batch, hidden_size), out16.shape
        assert hn16.shape == (batch, num_layers * hidden_size), hn16.shape
        assert jnp.allclose(out16, ref_out, atol=atol16, rtol=rtol16)
        assert jnp.allclose(hn16, ref_hn, atol=atol16, rtol=rtol16)

    # Small shapes consistent with the module's forward.
    _check(8, 2, 4, 32, 2, atol32=1e-5, rtol32=1e-5, atol16=5e-3, rtol16=5e-2)
    # Config exercising seq padding (prime length), multiple timestep groups,
    # and the H sub-slice MXU/VPU interleave (ping-pong) path.
    _check(13, 3, 8, 256, 2, atol32=1e-3, rtol32=1e-3, atol16=5e-2, rtol16=1e-1)
    print("KERNEL_OK")
</pallas_src>

<mosaic_0001>
module attributes {stable_mosaic.version = 11 : i64} {
  func.func @indrnn_layer_kernel(%arg0: i32, %arg1: i32, %arg2: memref<64x4xf32, #tpu.memory_space<vmem>>, %arg3: memref<4x32xf32, #tpu.memory_space<vmem>>, %arg4: memref<1x32xf32, #tpu.memory_space<vmem>>, %arg5: memref<1x32xf32, #tpu.memory_space<vmem>>, %arg6: memref<64x32xf32, #tpu.memory_space<vmem>>, %arg7: memref<64x32xf32, #tpu.memory_space<vmem>>, %arg8: memref<64x32xf32, #tpu.memory_space<vmem>>, %arg9: memref<8x32xf32, #tpu.memory_space<vmem>>) attributes {dimension_semantics = [#tpu.dimension_semantics<parallel>, #tpu.dimension_semantics<arbitrary>], iteration_bounds = array<i64: 1, 1>, scalar_prefetch = 0 : i64, scratch_operands = 3 : i64, tpu.core_type = #tpu.core_type<tc>, window_params = [{transform_indices = @transform_0, window_bounds = array<i64: 64, 4>}, {transform_indices = @transform_1, window_bounds = array<i64: 4, 32>}, {transform_indices = @transform_2, window_bounds = array<i64: 1, 32>}, {transform_indices = @transform_3, window_bounds = array<i64: 1, 32>}, {transform_indices = @transform_4, window_bounds = array<i64: 64, 32>}]} {
    %c0_i32 = arith.constant 0 : i32
    %0 = arith.cmpi eq, %arg1, %c0_i32 : i32
    %1 = arith.extui %0 : i1 to i32
    %c0_i32_0 = arith.constant 0 : i32
    %2 = arith.cmpi ne, %1, %c0_i32_0 : i32
    scf.if %2 {
      %cst_39 = arith.constant 0.000000e+00 : f32
      %93 = vector.broadcast %cst_39 : f32 to vector<8x32xf32>
      %c0_40 = arith.constant 0 : index
      %c0_41 = arith.constant 0 : index
      %94 = vector.load %arg9[%c0_40, %c0_41] : memref<8x32xf32, #tpu.memory_space<vmem>>, vector<8x32xf32>
      tpu.vector_store %arg9[%c0_40, %c0_41], %93 {strides = array<i32>} : memref<8x32xf32, #tpu.memory_space<vmem>>, vector<8x32xf32>,
    } else {
    }
    %c0 = arith.constant 0 : index
    %c0_1 = arith.constant 0 : index
    %3 = vector.load %arg2[%c0, %c0_1] : memref<64x4xf32, #tpu.memory_space<vmem>>, vector<64x4xf32>
    %c0_2 = arith.constant 0 : index
    %c0_3 = arith.constant 0 : index
    %4 = vector.load %arg3[%c0_2, %c0_3] : memref<4x32xf32, #tpu.memory_space<vmem>>, vector<4x32xf32>
    %cst = arith.constant dense<0.000000e+00> : vector<64x32xf32>
    %5 = tpu.matmul %3, %4, %cst {dimension_numbers = #tpu.dot_dimension_numbers<[1], [0], [0], [1], [0, 0, 1, 1], [], []>} : vector<64x4xf32>, vector<4x32xf32>, vector<64x32xf32> -> vector<64x32xf32>
    %c0_4 = arith.constant 0 : index
    %c0_5 = arith.constant 0 : index
    %6 = vector.load %arg7[%c0_4, %c0_5] : memref<64x32xf32, #tpu.memory_space<vmem>>, vector<64x32xf32>
    tpu.vector_store %arg7[%c0_4, %c0_5], %5 {strides = array<i32>} : memref<64x32xf32, #tpu.memory_space<vmem>>, vector<64x32xf32>,
    %c0_6 = arith.constant 0 : index
    %c0_7 = arith.constant 0 : index
    %7 = vector.load %arg5[%c0_6, %c0_7] : memref<1x32xf32, #tpu.memory_space<vmem>>, vector<1x32xf32>
    %8 = vector.shape_cast %7 : vector<1x32xf32> to vector<1x32xf32>
    %9 = vector.broadcast %8 : vector<1x32xf32> to vector<8x32xf32>
    %c0_8 = arith.constant 0 : index
    %c0_9 = arith.constant 0 : index
    %10 = vector.load %arg4[%c0_8, %c0_9] : memref<1x32xf32, #tpu.memory_space<vmem>>, vector<1x32xf32>
    %11 = vector.shape_cast %10 : vector<1x32xf32> to vector<1x32xf32>
    %12 = vector.broadcast %11 : vector<1x32xf32> to vector<8x32xf32>
    %c0_10 = arith.constant 0 : index
    %c0_11 = arith.constant 0 : index
    %13 = vector.load %arg9[%c0_10, %c0_11] : memref<8x32xf32, #tpu.memory_space<vmem>>, vector<8x32xf32>
    %c0_i32_12 = arith.constant 0 : i32
    %c64_i32 = arith.constant 64 : i32
    %14 = arith.muli %c0_i32_12, %c64_i32 : i32
    %15 = tpu.assume_multiple %14, 64 : i32
    %c0_i32_13 = arith.constant 0 : i32
    %16 = arith.addi %15, %c0_i32_13 : i32
    %17 = arith.index_cast %16 : i32 to index
    %c0_14 = arith.constant 0 : index
    %18 = vector.load %arg7[%17, %c0_14] : memref<64x32xf32, #tpu.memory_space<vmem>>, vector<8x32xf32>
    %19 = arith.mulf %9, %13 : vector<8x32xf32>
    %20 = arith.addf %19, %12 : vector<8x32xf32>
    %21 = arith.addf %18, %20 : vector<8x32xf32>
    %cst_15 = arith.constant 0.000000e+00 : f32
    %22 = vector.broadcast %cst_15 : f32 to vector<8x32xf32>
    %23 = arith.maximumf %21, %22 : vector<8x32xf32>
    %c8_i32 = arith.constant 8 : i32
    %24 = arith.addi %16, %c8_i32 : i32
    %25 = arith.index_cast %24 : i32 to index
    %c0_16 = arith.constant 0 : index
    %26 = vector.load %arg7[%25, %c0_16] : memref<64x32xf32, #tpu.memory_space<vmem>>, vector<8x32xf32>
    %27 = arith.mulf %9, %23 : vector<8x32xf32>
    %28 = arith.addf %27, %12 : vector<8x32xf32>
    %29 = arith.addf %26, %28 : vector<8x32xf32>
    %cst_17 = arith.constant 0.000000e+00 : f32
    %30 = vector.broadcast %cst_17 : f32 to vector<8x32xf32>
    %31 = arith.maximumf %29, %30 : vector<8x32xf32>
    %32 = tpu.concatenate %23, %31 in 0 : vector<8x32xf32>, vector<8x32xf32> -> vector<16x32xf32>
    %33 = arith.index_cast %16 : i32 to index
    %c0_18 = arith.constant 0 : index
    %34 = vector.load %arg6[%33, %c0_18] : memref<64x32xf32, #tpu.memory_space<vmem>>, vector<16x32xf32>
    tpu.vector_store %arg6[%33, %c0_18], %32 {strides = array<i32>} : memref<64x32xf32, #tpu.memory_space<vmem>>, vector<16x32xf32>,
    %c16_i32 = arith.constant 16 : i32
    %35 = arith.addi %15, %c16_i32 : i32
    %36 = arith.index_cast %35 : i32 to index
    %c0_19 = arith.constant 0 : index
    %37 = vector.load %arg7[%36, %c0_19] : memref<64x32xf32, #tpu.memory_space<vmem>>, vector<8x32xf32>
    %38 = arith.mulf %9, %31 : vector<8x32xf32>
    %39 = arith.addf %38, %12 : vector<8x32xf32>
    %40 = arith.addf %37, %39 : vector<8x32xf32>
    %cst_20 = arith.constant 0.000000e+00 : f32
    %41 = vector.broadcast %cst_20 : f32 to vector<8x32xf32>
    %42 = arith.maximumf %40, %41 : vector<8x32xf32>
    %c8_i32_21 = arith.constant 8 : i32
    %43 = arith.addi %35, %c8_i32_21 : i32
    %44 = arith.index_cast %43 : i32 to index
    %c0_22 = arith.constant 0 : index
    %45 = vector.load %arg7[%44, %c0_22] : memref<64x32xf32, #tpu.memory_space<vmem>>, vector<8x32xf32>
    %46 = arith.mulf %9, %42 : vector<8x32xf32>
    %47 = arith.addf %46, %12 : vector<8x32xf32>
    %48 = arith.addf %45, %47 : vector<8x32xf32>
    %cst_23 = arith.constant 0.000000e+00 : f32
    %49 = vector.broadcast %cst_23 : f32 to vector<8x32xf32>
    %50 = arith.maximumf %48, %49 : vector<8x32xf32>
    %51 = tpu.concatenate %42, %50 in 0 : vector<8x32xf32>, vector<8x32xf32> -> vector<16x32xf32>
    %52 = arith.index_cast %35 : i32 to index
    %c0_24 = arith.constant 0 : index
    %53 = vector.load %arg6[%52, %c0_24] : memref<64x32xf32, #tpu.memory_space<vmem>>, vector<16x32xf32>
    tpu.vector_store %arg6[%52, %c0_24], %51 {strides = array<i32>} : memref<64x32xf32, #tpu.memory_space<vmem>>, vector<16x32xf32>,
    %c32_i32 = arith.constant 32 : i32
    %54 = arith.addi %15, %c32_i32 : i32
    %55 = arith.index_cast %54 : i32 to index
    %c0_25 = arith.constant 0 : index
    %56 = vector.load %arg7[%55, %c0_25] : memref<64x32xf32, #tpu.memory_space<vmem>>, vector<8x32xf32>
    %57 = arith.mulf %9, %50 : vector<8x32xf32>
    %58 = arith.addf %57, %12 : vector<8x32xf32>
    %59 = arith.addf %56, %58 : vector<8x32xf32>
    %cst_26 = arith.constant 0.000000e+00 : f32
    %60 = vector.broadcast %cst_26 : f32 to vector<8x32xf32>
    %61 = arith.maximumf %59, %60 : vector<8x32xf32>
    %c8_i32_27 = arith.constant 8 : i32
    %62 = arith.addi %54, %c8_i32_27 : i32
    %63 = arith.index_cast %62 : i32 to index
    %c0_28 = arith.constant 0 : index
    %64 = vector.load %arg7[%63, %c0_28] : memref<64x32xf32, #tpu.memory_space<vmem>>, vector<8x32xf32>
    %65 = arith.mulf %9, %61 : vector<8x32xf32>
    %66 = arith.addf %65, %12 : vector<8x32xf32>
    %67 = arith.addf %64, %66 : vector<8x32xf32>
    %cst_29 = arith.constant 0.000000e+00 : f32
    %68 = vector.broadcast %cst_29 : f32 to vector<8x32xf32>
    %69 = arith.maximumf %67, %68 : vector<8x32xf32>
    %70 = tpu.concatenate %61, %69 in 0 : vector<8x32xf32>, vector<8x32xf32> -> vector<16x32xf32>
    %71 = arith.index_cast %54 : i32 to index
    %c0_30 = arith.constant 0 : index
    %72 = vector.load %arg6[%71, %c0_30] : memref<64x32xf32, #tpu.memory_space<vmem>>, vector<16x32xf32>
    tpu.vector_store %arg6[%71, %c0_30], %70 {strides = array<i32>} : memref<64x32xf32, #tpu.memory_space<vmem>>, vector<16x32xf32>,
    %c48_i32 = arith.constant 48 : i32
    %73 = arith.addi %15, %c48_i32 : i32
    %74 = arith.index_cast %73 : i32 to index
    %c0_31 = arith.constant 0 : index
    %75 = vector.load %arg7[%74, %c0_31] : memref<64x32xf32, #tpu.memory_space<vmem>>, vector<8x32xf32>
    %76 = arith.mulf %9, %69 : vector<8x32xf32>
    %77 = arith.addf %76, %12 : vector<8x32xf32>
    %78 = arith.addf %75, %77 : vector<8x32xf32>
    %cst_32 = arith.constant 0.000000e+00 : f32
    %79 = vector.broadcast %cst_32 : f32 to vector<8x32xf32>
    %80 = arith.maximumf %78, %79 : vector<8x32xf32>
    %c8_i32_33 = arith.constant 8 : i32
    %81 = arith.addi %73, %c8_i32_33 : i32
    %82 = arith.index_cast %81 : i32 to index
    %c0_34 = arith.constant 0 : index
    %83 = vector.load %arg7[%82, %c0_34] : memref<64x32xf32, #tpu.memory_space<vmem>>, vector<8x32xf32>
    %84 = arith.mulf %9, %80 : vector<8x32xf32>
    %85 = arith.addf %84, %12 : vector<8x32xf32>
    %86 = arith.addf %83, %85 : vector<8x32xf32>
    %cst_35 = arith.constant 0.000000e+00 : f32
    %87 = vector.broadcast %cst_35 : f32 to vector<8x32xf32>
    %88 = arith.maximumf %86, %87 : vector<8x32xf32>
    %89 = tpu.concatenate %80, %88 in 0 : vector<8x32xf32>, vector<8x32xf32> -> vector<16x32xf32>
    %90 = arith.index_cast %73 : i32 to index
    %c0_36 = arith.constant 0 : index
    %91 = vector.load %arg6[%90, %c0_36] : memref<64x32xf32, #tpu.memory_space<vmem>>, vector<16x32xf32>
    tpu.vector_store %arg6[%90, %c0_36], %89 {strides = array<i32>} : memref<64x32xf32, #tpu.memory_space<vmem>>, vector<16x32xf32>,
    %c1_i32 = arith.constant 1 : i32
    %c0_37 = arith.constant 0 : index
    %c0_38 = arith.constant 0 : index
    %92 = vector.load %arg9[%c0_37, %c0_38] : memref<8x32xf32, #tpu.memory_space<vmem>>, vector<8x32xf32>
    tpu.vector_store %arg9[%c0_37, %c0_38], %88 {strides = array<i32>} : memref<8x32xf32, #tpu.memory_space<vmem>>, vector<8x32xf32>,
    return
  }
  func.func @transform_0(%arg0: i32, %arg1: i32) -> (i32, i32) {
    %c0_i32 = arith.constant 0 : i32
    %c0_i32_0 = arith.constant 0 : i32
    return %arg1, %c0_i32 : i32, i32
  }
  func.func @transform_1(%arg0: i32, %arg1: i32) -> (i32, i32) {
    %c0_i32 = arith.constant 0 : i32
    %c0_i32_0 = arith.constant 0 : i32
    return %c0_i32, %arg0 : i32, i32
  }
  func.func @transform_2(%arg0: i32, %arg1: i32) -> (i32, i32) {
    %c0_i32 = arith.constant 0 : i32
    %c0_i32_0 = arith.constant 0 : i32
    return %c0_i32, %arg0 : i32, i32
  }
  func.func @transform_3(%arg0: i32, %arg1: i32) -> (i32, i32) {
    %c0_i32 = arith.constant 0 : i32
    %c0_i32_0 = arith.constant 0 : i32
    return %c0_i32, %arg0 : i32, i32
  }
  func.func @transform_4(%arg0: i32, %arg1: i32) -> (i32, i32) {
    %c0_i32 = arith.constant 0 : i32
    return %arg1, %arg0 : i32, i32
  }
}

module attributes {stable_mosaic.version = 11 : i64} {
  func.func @indrnn_layer_kernel(%arg0: i32, %arg1: i32, %arg2: memref<64x32xf32, #tpu.memory_space<vmem>>, %arg3: memref<32x32xf32, #tpu.memory_space<vmem>>, %arg4: memref<1x32xf32, #tpu.memory_space<vmem>>, %arg5: memref<1x32xf32, #tpu.memory_space<vmem>>, %arg6: memref<64x32xf32, #tpu.memory_space<vmem>>, %arg7: memref<64x32xf32, #tpu.memory_space<vmem>>, %arg8: memref<64x32xf32, #tpu.memory_space<vmem>>, %arg9: memref<8x32xf32, #tpu.memory_space<vmem>>) attributes {dimension_semantics = [#tpu.dimension_semantics<parallel>, #tpu.dimension_semantics<arbitrary>], iteration_bounds = array<i64: 1, 1>, scalar_prefetch = 0 : i64, scratch_operands = 3 : i64, tpu.core_type = #tpu.core_type<tc>, window_params = [{transform_indices = @transform_0, window_bounds = array<i64: 64, 32>}, {transform_indices = @transform_1, window_bounds = array<i64: 32, 32>}, {transform_indices = @transform_2, window_bounds = array<i64: 1, 32>}, {transform_indices = @transform_3, window_bounds = array<i64: 1, 32>}, {transform_indices = @transform_4, window_bounds = array<i64: 64, 32>}]} {
    %c0_i32 = arith.constant 0 : i32
    %0 = arith.cmpi eq, %arg1, %c0_i32 : i32
    %1 = arith.extui %0 : i1 to i32
    %c0_i32_0 = arith.constant 0 : i32
    %2 = arith.cmpi ne, %1, %c0_i32_0 : i32
    scf.if %2 {
      %cst_39 = arith.constant 0.000000e+00 : f32
      %93 = vector.broadcast %cst_39 : f32 to vector<8x32xf32>
      %c0_40 = arith.constant 0 : index
      %c0_41 = arith.constant 0 : index
      %94 = vector.load %arg9[%c0_40, %c0_41] : memref<8x32xf32, #tpu.memory_space<vmem>>, vector<8x32xf32>
      tpu.vector_store %arg9[%c0_40, %c0_41], %93 {strides = array<i32>} : memref<8x32xf32, #tpu.memory_space<vmem>>, vector<8x32xf32>,
    } else {
    }
    %c0 = arith.constant 0 : index
    %c0_1 = arith.constant 0 : index
    %3 = vector.load %arg2[%c0, %c0_1] : memref<64x32xf32, #tpu.memory_space<vmem>>, vector<64x32xf32>
    %c0_2 = arith.constant 0 : index
    %c0_3 = arith.constant 0 : index
    %4 = vector.load %arg3[%c0_2, %c0_3] : memref<32x32xf32, #tpu.memory_space<vmem>>, vector<32x32xf32>
    %cst = arith.constant dense<0.000000e+00> : vector<64x32xf32>
    %5 = tpu.matmul %3, %4, %cst {dimension_numbers = #tpu.dot_dimension_numbers<[1], [0], [0], [1], [0, 0, 1, 1], [], []>} : vector<64x32xf32>, vector<32x32xf32>, vector<64x32xf32> -> vector<64x32xf32>
    %c0_4 = arith.constant 0 : index
    %c0_5 = arith.constant 0 : index
    %6 = vector.load %arg7[%c0_4, %c0_5] : memref<64x32xf32, #tpu.memory_space<vmem>>, vector<64x32xf32>
    tpu.vector_store %arg7[%c0_4, %c0_5], %5 {strides = array<i32>} : memref<64x32xf32, #tpu.memory_space<vmem>>, vector<64x32xf32>,
    %c0_6 = arith.constant 0 : index
    %c0_7 = arith.constant 0 : index
    %7 = vector.load %arg5[%c0_6, %c0_7] : memref<1x32xf32, #tpu.memory_space<vmem>>, vector<1x32xf32>
    %8 = vector.shape_cast %7 : vector<1x32xf32> to vector<1x32xf32>
    %9 = vector.broadcast %8 : vector<1x32xf32> to vector<8x32xf32>
    %c0_8 = arith.constant 0 : index
    %c0_9 = arith.constant 0 : index
    %10 = vector.load %arg4[%c0_8, %c0_9] : memref<1x32xf32, #tpu.memory_space<vmem>>, vector<1x32xf32>
    %11 = vector.shape_cast %10 : vector<1x32xf32> to vector<1x32xf32>
    %12 = vector.broadcast %11 : vector<1x32xf32> to vector<8x32xf32>
    %c0_10 = arith.constant 0 : index
    %c0_11 = arith.constant 0 : index
    %13 = vector.load %arg9[%c0_10, %c0_11] : memref<8x32xf32, #tpu.memory_space<vmem>>, vector<8x32xf32>
    %c0_i32_12 = arith.constant 0 : i32
    %c64_i32 = arith.constant 64 : i32
    %14 = arith.muli %c0_i32_12, %c64_i32 : i32
    %15 = tpu.assume_multiple %14, 64 : i32
    %c0_i32_13 = arith.constant 0 : i32
    %16 = arith.addi %15, %c0_i32_13 : i32
    %17 = arith.index_cast %16 : i32 to index
    %c0_14 = arith.constant 0 : index
    %18 = vector.load %arg7[%17, %c0_14] : memref<64x32xf32, #tpu.memory_space<vmem>>, vector<8x32xf32>
    %19 = arith.mulf %9, %13 : vector<8x32xf32>
    %20 = arith.addf %19, %12 : vector<8x32xf32>
    %21 = arith.addf %18, %20 : vector<8x32xf32>
    %cst_15 = arith.constant 0.000000e+00 : f32
    %22 = vector.broadcast %cst_15 : f32 to vector<8x32xf32>
    %23 = arith.maximumf %21, %22 : vector<8x32xf32>
    %c8_i32 = arith.constant 8 : i32
    %24 = arith.addi %16, %c8_i32 : i32
    %25 = arith.index_cast %24 : i32 to index
    %c0_16 = arith.constant 0 : index
    %26 = vector.load %arg7[%25, %c0_16] : memref<64x32xf32, #tpu.memory_space<vmem>>, vector<8x32xf32>
    %27 = arith.mulf %9, %23 : vector<8x32xf32>
    %28 = arith.addf %27, %12 : vector<8x32xf32>
    %29 = arith.addf %26, %28 : vector<8x32xf32>
    %cst_17 = arith.constant 0.000000e+00 : f32
    %30 = vector.broadcast %cst_17 : f32 to vector<8x32xf32>
    %31 = arith.maximumf %29, %30 : vector<8x32xf32>
    %32 = tpu.concatenate %23, %31 in 0 : vector<8x32xf32>, vector<8x32xf32> -> vector<16x32xf32>
    %33 = arith.index_cast %16 : i32 to index
    %c0_18 = arith.constant 0 : index
    %34 = vector.load %arg6[%33, %c0_18] : memref<64x32xf32, #tpu.memory_space<vmem>>, vector<16x32xf32>
    tpu.vector_store %arg6[%33, %c0_18], %32 {strides = array<i32>} : memref<64x32xf32, #tpu.memory_space<vmem>>, vector<16x32xf32>,
    %c16_i32 = arith.constant 16 : i32
    %35 = arith.addi %15, %c16_i32 : i32
    %36 = arith.index_cast %35 : i32 to index
    %c0_19 = arith.constant 0 : index
    %37 = vector.load %arg7[%36, %c0_19] : memref<64x32xf32, #tpu.memory_space<vmem>>, vector<8x32xf32>
    %38 = arith.mulf %9, %31 : vector<8x32xf32>
    %39 = arith.addf %38, %12 : vector<8x32xf32>
    %40 = arith.addf %37, %39 : vector<8x32xf32>
    %cst_20 = arith.constant 0.000000e+00 : f32
    %41 = vector.broadcast %cst_20 : f32 to vector<8x32xf32>
    %42 = arith.maximumf %40, %41 : vector<8x32xf32>
    %c8_i32_21 = arith.constant 8 : i32
    %43 = arith.addi %35, %c8_i32_21 : i32
    %44 = arith.index_cast %43 : i32 to index
    %c0_22 = arith.constant 0 : index
    %45 = vector.load %arg7[%44, %c0_22] : memref<64x32xf32, #tpu.memory_space<vmem>>, vector<8x32xf32>
    %46 = arith.mulf %9, %42 : vector<8x32xf32>
    %47 = arith.addf %46, %12 : vector<8x32xf32>
    %48 = arith.addf %45, %47 : vector<8x32xf32>
    %cst_23 = arith.constant 0.000000e+00 : f32
    %49 = vector.broadcast %cst_23 : f32 to vector<8x32xf32>
    %50 = arith.maximumf %48, %49 : vector<8x32xf32>
    %51 = tpu.concatenate %42, %50 in 0 : vector<8x32xf32>, vector<8x32xf32> -> vector<16x32xf32>
    %52 = arith.index_cast %35 : i32 to index
    %c0_24 = arith.constant 0 : index
    %53 = vector.load %arg6[%52, %c0_24] : memref<64x32xf32, #tpu.memory_space<vmem>>, vector<16x32xf32>
    tpu.vector_store %arg6[%52, %c0_24], %51 {strides = array<i32>} : memref<64x32xf32, #tpu.memory_space<vmem>>, vector<16x32xf32>,
    %c32_i32 = arith.constant 32 : i32
    %54 = arith.addi %15, %c32_i32 : i32
    %55 = arith.index_cast %54 : i32 to index
    %c0_25 = arith.constant 0 : index
    %56 = vector.load %arg7[%55, %c0_25] : memref<64x32xf32, #tpu.memory_space<vmem>>, vector<8x32xf32>
    %57 = arith.mulf %9, %50 : vector<8x32xf32>
    %58 = arith.addf %57, %12 : vector<8x32xf32>
    %59 = arith.addf %56, %58 : vector<8x32xf32>
    %cst_26 = arith.constant 0.000000e+00 : f32
    %60 = vector.broadcast %cst_26 : f32 to vector<8x32xf32>
    %61 = arith.maximumf %59, %60 : vector<8x32xf32>
    %c8_i32_27 = arith.constant 8 : i32
    %62 = arith.addi %54, %c8_i32_27 : i32
    %63 = arith.index_cast %62 : i32 to index
    %c0_28 = arith.constant 0 : index
    %64 = vector.load %arg7[%63, %c0_28] : memref<64x32xf32, #tpu.memory_space<vmem>>, vector<8x32xf32>
    %65 = arith.mulf %9, %61 : vector<8x32xf32>
    %66 = arith.addf %65, %12 : vector<8x32xf32>
    %67 = arith.addf %64, %66 : vector<8x32xf32>
    %cst_29 = arith.constant 0.000000e+00 : f32
    %68 = vector.broadcast %cst_29 : f32 to vector<8x32xf32>
    %69 = arith.maximumf %67, %68 : vector<8x32xf32>
    %70 = tpu.concatenate %61, %69 in 0 : vector<8x32xf32>, vector<8x32xf32> -> vector<16x32xf32>
    %71 = arith.index_cast %54 : i32 to index
    %c0_30 = arith.constant 0 : index
    %72 = vector.load %arg6[%71, %c0_30] : memref<64x32xf32, #tpu.memory_space<vmem>>, vector<16x32xf32>
    tpu.vector_store %arg6[%71, %c0_30], %70 {strides = array<i32>} : memref<64x32xf32, #tpu.memory_space<vmem>>, vector<16x32xf32>,
    %c48_i32 = arith.constant 48 : i32
    %73 = arith.addi %15, %c48_i32 : i32
    %74 = arith.index_cast %73 : i32 to index
    %c0_31 = arith.constant 0 : index
    %75 = vector.load %arg7[%74, %c0_31] : memref<64x32xf32, #tpu.memory_space<vmem>>, vector<8x32xf32>
    %76 = arith.mulf %9, %69 : vector<8x32xf32>
    %77 = arith.addf %76, %12 : vector<8x32xf32>
    %78 = arith.addf %75, %77 : vector<8x32xf32>
    %cst_32 = arith.constant 0.000000e+00 : f32
    %79 = vector.broadcast %cst_32 : f32 to vector<8x32xf32>
    %80 = arith.maximumf %78, %79 : vector<8x32xf32>
    %c8_i32_33 = arith.constant 8 : i32
    %81 = arith.addi %73, %c8_i32_33 : i32
    %82 = arith.index_cast %81 : i32 to index
    %c0_34 = arith.constant 0 : index
    %83 = vector.load %arg7[%82, %c0_34] : memref<64x32xf32, #tpu.memory_space<vmem>>, vector<8x32xf32>
    %84 = arith.mulf %9, %80 : vector<8x32xf32>
    %85 = arith.addf %84, %12 : vector<8x32xf32>
    %86 = arith.addf %83, %85 : vector<8x32xf32>
    %cst_35 = arith.constant 0.000000e+00 : f32
    %87 = vector.broadcast %cst_35 : f32 to vector<8x32xf32>
    %88 = arith.maximumf %86, %87 : vector<8x32xf32>
    %89 = tpu.concatenate %80, %88 in 0 : vector<8x32xf32>, vector<8x32xf32> -> vector<16x32xf32>
    %90 = arith.index_cast %73 : i32 to index
    %c0_36 = arith.constant 0 : index
    %91 = vector.load %arg6[%90, %c0_36] : memref<64x32xf32, #tpu.memory_space<vmem>>, vector<16x32xf32>
    tpu.vector_store %arg6[%90, %c0_36], %89 {strides = array<i32>} : memref<64x32xf32, #tpu.memory_space<vmem>>, vector<16x32xf32>,
    %c1_i32 = arith.constant 1 : i32
    %c0_37 = arith.constant 0 : index
    %c0_38 = arith.constant 0 : index
    %92 = vector.load %arg9[%c0_37, %c0_38] : memref<8x32xf32, #tpu.memory_space<vmem>>, vector<8x32xf32>
    tpu.vector_store %arg9[%c0_37, %c0_38], %88 {strides = array<i32>} : memref<8x32xf32, #tpu.memory_space<vmem>>, vector<8x32xf32>,
    return
  }
  func.func @transform_0(%arg0: i32, %arg1: i32) -> (i32, i32) {
    %c0_i32 = arith.constant 0 : i32
    %c0_i32_0 = arith.constant 0 : i32
    return %arg1, %c0_i32 : i32, i32
  }
  func.func @transform_1(%arg0: i32, %arg1: i32) -> (i32, i32) {
    %c0_i32 = arith.constant 0 : i32
    %c0_i32_0 = arith.constant 0 : i32
    return %c0_i32, %arg0 : i32, i32
  }
  func.func @transform_2(%arg0: i32, %arg1: i32) -> (i32, i32) {
    %c0_i32 = arith.constant 0 : i32
    %c0_i32_0 = arith.constant 0 : i32
    return %c0_i32, %arg0 : i32, i32
  }
  func.func @transform_3(%arg0: i32, %arg1: i32) -> (i32, i32) {
    %c0_i32 = arith.constant 0 : i32
    %c0_i32_0 = arith.constant 0 : i32
    return %c0_i32, %arg0 : i32, i32
  }
  func.func @transform_4(%arg0: i32, %arg1: i32) -> (i32, i32) {
    %c0_i32 = arith.constant 0 : i32
    return %arg1, %arg0 : i32, i32
  }
}

</mosaic_0001>

<bundles_post_ra>
// kernel: indrnn_v2_forward.2
= control target key start
LH: loop header
LB: loop body
LE: loop exit
PB: predicated region body
PF: predicated region fallthrough
CT: control target
= control target key end

     0   :  { %vm57_vm0 = vcmask 1043456   ;;  %vm32_vm1 = vcmask 31744   ;;  %vm21_vm2 = vcmask 261120   ;;  %v313_v9 = vmov 0.0   ;;  %s422_s1 = inlined_call_operand.vmem [shape: f32[4,32], index: 1, kind: input, shape index: {}]   ;;  %s423_s0 = inlined_call_operand.vmem [shape: f32[64,4], index: 0, kind: input, shape index: {}]   ;;  %s424_s3 = inlined_call_operand.vmem [shape: f32[1,32], index: 3, kind: input, shape index: {}]   ;;  %s425_s2 = inlined_call_operand.vmem [shape: f32[1,32], index: 2, kind: input, shape index: {}]   ;;  %s426_s4 = inlined_call_operand.vmem [shape: f32[64,32], index: 4, kind: output, shape index: {}]  }
   0x1   :  { %v31_v0 = vld [vmem:[%s422_s1] sm:$0xf]  ;;  %v24_v2 = vld [vmem:[%s423_s0 + $0x8] sm:$0xff]  ;;  %v25_v3 = vld [vmem:[%s423_s0 + $0x10] sm:$0xff]  ;;  %22 = vst.msk [vmem:[#allocation4] sm:$0xff] %vm21_vm2, %v313_v9 }
   0x2   :  { %v23_v1 = vld [vmem:[%s423_s0] sm:$0xff]  ;;  %296 = vmatprep.subr.msk.mxu0 %vm57_vm0, %v31_v0  ;;  %310 = vmatprep.subr.msk.mxu1 %vm57_vm0, %v31_v0  ;;  %v28_v5 = vld [vmem:[%s423_s0 + $0x28] sm:$0xff]  ;;  %v29_v6 = vld [vmem:[%s423_s0 + $0x30] sm:$0xff] }
   0x3   :  { %298 = vmatprep.mubr.msk.f32.mxu0 %vm32_vm1, %v23_v1  ;;  %v27_v4 = vld [vmem:[%s423_s0 + $0x20] sm:$0xff]  ;;  %297 = vmatpush3.msk.msra.mxu0 %vm57_vm0, %v31_v0  ;;  %v26_v7 = vld [vmem:[%s423_s0 + $0x18] sm:$0xff] }
   0x4   :  { %299 = vmatmul.mubr.msk.f32.vlgmr.msra.gmra.mrb[0].mxu0 %vm32_vm1, %v24_v2  ;;  %311 = vmatpush3.msk.msra.mxu1 %vm57_vm0, %v31_v0  ;;  %v30_v8 = vld [vmem:[%s423_s0 + $0x38] sm:$0xff]  ;;  %v279_v10 = vld [vmem:[%s424_s3] ss:$0 sm:$0xff] }
   0x5   :  { %301 = vmatprep.mubr.msk.f32.mxu0 %vm32_vm1, %v25_v3  ;;  %304 = vmatprep.mubr.msk.f32.mxu1 %vm32_vm1, %v27_v4  ;;  %v280_v16 = vld [vmem:[%s425_s2] ss:$0 sm:$0xff] }
   0x6   :  { %305 = vmatmul.mubr.msk.f32.vlgmr.msra.gmra.mrb[0].mxu1 %vm32_vm1, %v28_v5 }
   0x7   :  { %307 = vmatprep.mubr.msk.f32.mxu1 %vm32_vm1, %v29_v6 }
   0x8   :  { %302 = vmatmul.mubr.msk.f32.gmra.mrb[2].mxu0 %vm32_vm1, %v26_v7  ;;  %v189_v11 = vld [vmem:[#allocation4] sm:$0xff] }
   0x9   :  { %v191_v14 = vmul.f32 %v279_v10, %v189_v11 }
   0xa   :  { %308 = vmatmul.mubr.msk.f32.gmra.mrb[2].mxu1 %vm32_vm1, %v30_v8 }
   0xb   :  { %v192_v20 = vadd.f32 %v280_v16, %v191_v14 }
  0xd7   :  { %v300_v12 = vpop.f32.mrb[0].mxu0 }
  0xd8   :  { %168 = vst.msk [vmem:[#allocation2 + $0x8] sm:$0xff] %vm21_vm2, %v300_v12  ;;  %v127_v13 = vpop.f32.mrb[1].mxu0 }
  0xd9   :  { %167 = vst.msk [vmem:[#allocation2] sm:$0xff] %vm21_vm2, %v127_v13  ;;  %v306_v15 = vpop.f32.mrb[0].mxu1 }
  0xda   :  { %172 = vst.msk [vmem:[#allocation2 + $0x28] sm:$0xff] %vm21_vm2, %v306_v15  ;;  %v147_v17 = vpop.f32.mrb[1].mxu1 }
  0xdb   :  { %v303_v18 = vpop.f32.mrb[2].mxu0  ;;  %171 = vst.msk [vmem:[#allocation2 + $0x20] sm:$0xff] %vm21_vm2, %v147_v17 }
  0xdc   :  { %170 = vst.msk [vmem:[#allocation2 + $0x18] sm:$0xff] %vm21_vm2, %v303_v18  ;;  %v137_v19 = vpop.f32.mrb[3].mxu0 }
  0xdd   :  { %169 = vst.msk [vmem:[#allocation2 + $0x10] sm:$0xff] %vm21_vm2, %v137_v19  ;;  %v309_v21 = vpop.f32.mrb[2].mxu1 }
  0xde   :  { %174 = vst.msk [vmem:[#allocation2 + $0x38] sm:$0xff] %vm21_vm2, %v309_v21  ;;  %v157_v22 = vpop.f32.mrb[3].mxu1 }
  0xdf   :  { %173 = vst.msk [vmem:[#allocation2 + $0x30] sm:$0xff] %vm21_vm2, %v157_v22  ;;  %v197_v28 = vld [vmem:[#allocation2 + $0x8] sm:$0xff] }
  0xe0   :  { %v190_v23 = vld [vmem:[#allocation2] sm:$0xff] }
  0xe1   :  { %v193_v24 = vadd.f32 %v192_v20, %v190_v23  ;;  %v230_v48 = vld [vmem:[#allocation2 + $0x28] sm:$0xff] }
  0xe2   :  { %v223_v42 = vld [vmem:[#allocation2 + $0x20] sm:$0xff] }
  0xe3   :  { %v194_v25 = vmax.f32 %v193_v24, 0.0  ;;  %v213_v38 = vld [vmem:[#allocation2 + $0x18] sm:$0xff] }
  0xe4   :  { %v206_v32 = vld [vmem:[#allocation2 + $0x10] sm:$0xff] }
  0xe5   :  { %v198_v26 = vmul.f32 %v279_v10, %v194_v25  ;;  %202 = vst.msk [vmem:[%s426_s4] sm:$0xff] %vm21_vm2, %v194_v25  ;;  %v247_v58 = vld [vmem:[#allocation2 + $0x38] sm:$0xff] }
  0xe6   :  { %v240_v52 = vld [vmem:[#allocation2 + $0x30] sm:$0xff] }
  0xe7   :  { %v199_v27 = vadd.f32 %v280_v16, %v198_v26 }
  0xe9   :  { %v200_v29 = vadd.f32 %v199_v27, %v197_v28 }
  0xeb   :  { %v201_v30 = vmax.f32 %v200_v29, 0.0 }
  0xed   :  { %203 = vst.msk [vmem:[%s426_s4 + $0x8] sm:$0xff] %vm21_vm2, %v201_v30  ;;  %v207_v31 = vmul.f32 %v279_v10, %v201_v30 }
  0xef   :  { %v208_v33 = vadd.f32 %v280_v16, %v207_v31 }
  0xf1   :  { %v209_v34 = vadd.f32 %v208_v33, %v206_v32 }
  0xf3   :  { %v210_v35 = vmax.f32 %v209_v34, 0.0 }
  0xf5   :  { %v214_v36 = vmul.f32 %v279_v10, %v210_v35  ;;  %281 = vst.msk [vmem:[%s426_s4 + $0x10] sm:$0xff] %vm21_vm2, %v210_v35 }
  0xf7   :  { %v215_v37 = vadd.f32 %v280_v16, %v214_v36 }
  0xf9   :  { %v216_v39 = vadd.f32 %v215_v37, %v213_v38 }
  0xfb   :  { %v217_v40 = vmax.f32 %v216_v39, 0.0 }
  0xfd   :  { %282 = vst.msk [vmem:[%s426_s4 + $0x18] sm:$0xff] %vm21_vm2, %v217_v40  ;;  %v224_v41 = vmul.f32 %v279_v10, %v217_v40 }
  0xff   :  { %v225_v43 = vadd.f32 %v280_v16, %v224_v41 }
 0x101   :  { %v226_v44 = vadd.f32 %v225_v43, %v223_v42 }
 0x103   :  { %v227_v45 = vmax.f32 %v226_v44, 0.0 }
 0x105   :  { %v231_v46 = vmul.f32 %v279_v10, %v227_v45  ;;  %283 = vst.msk [vmem:[%s426_s4 + $0x20] sm:$0xff] %vm21_vm2, %v227_v45 }
 0x107   :  { %v232_v47 = vadd.f32 %v280_v16, %v231_v46 }
 0x109   :  { %v233_v49 = vadd.f32 %v232_v47, %v230_v48 }
 0x10b   :  { %v234_v50 = vmax.f32 %v233_v49, 0.0 }
 0x10d   :  { %284 = vst.msk [vmem:[%s426_s4 + $0x28] sm:$0xff] %vm21_vm2, %v234_v50  ;;  %v241_v51 = vmul.f32 %v279_v10, %v234_v50 }
 0x10f   :  { %v242_v53 = vadd.f32 %v280_v16, %v241_v51 }
 0x111   :  { %v243_v54 = vadd.f32 %v242_v53, %v240_v52 }
 0x113   :  { %v244_v55 = vmax.f32 %v243_v54, 0.0 }
 0x115   :  { %v248_v56 = vmul.f32 %v279_v10, %v244_v55  ;;  %285 = vst.msk [vmem:[%s426_s4 + $0x30] sm:$0xff] %vm21_vm2, %v244_v55 }
 0x117   :  { %v249_v57 = vadd.f32 %v280_v16, %v248_v56 }
 0x119   :  { %v250_v59 = vadd.f32 %v249_v57, %v247_v58 }
 0x11b   :  { %v251_v60 = vmax.f32 %v250_v59, 0.0 }
 0x11d   :  { %286 = vst.msk [vmem:[%s426_s4 + $0x38] sm:$0xff] %vm21_vm2, %v251_v60  ;;  %255 = vst.msk [vmem:[#allocation4] sm:$0xff] %vm21_vm2, %v251_v60 }

// kernel: indrnn_v2_forward.3
= control target key start
LH: loop header
LB: loop body
LE: loop exit
PB: predicated region body
PF: predicated region fallthrough
CT: control target
= control target key end

     0   :  { %vm21_vm0 = vcmask 261120   ;;  %v329_v14 = vmov 0.0   ;;  %s447_s1 = inlined_call_operand.vmem [shape: f32[32,32], index: 1, kind: input, shape index: {}]   ;;  %s448_s0 = inlined_call_operand.vmem [shape: f32[64,32], index: 0, kind: input, shape index: {}]   ;;  %s449_s3 = inlined_call_operand.vmem [shape: f32[1,32], index: 3, kind: input, shape index: {}]   ;;  %s450_s2 = inlined_call_operand.vmem [shape: f32[1,32], index: 2, kind: input, shape index: {}]   ;;  %s451_s4 = inlined_call_operand.vmem [shape: f32[64,32], index: 4, kind: output, shape index: {}]  }
   0x1   :  { %v31_v0 = vld [vmem:[%s447_s1] sm:$0xff]  ;;  %v32_v1 = vld [vmem:[%s447_s1 + $0x8] sm:$0xff]  ;;  %v33_v2 = vld [vmem:[%s447_s1 + $0x10] sm:$0xff]  ;;  %22 = vst.msk [vmem:[#allocation4] sm:$0xff] %vm21_vm0, %v329_v14 }
   0x2   :  { %v316_v3 = vpack.c.bf16 %v32_v1, %v31_v0  ;;  %v34_v4 = vld [vmem:[%s447_s1 + $0x18] sm:$0xff]  ;;  %v23_v5 = vld [vmem:[%s448_s0] sm:$0xff]  ;;  %v24_v8 = vld [vmem:[%s448_s0 + $0x8] sm:$0xff] }
   0x3   :  { %v320_v6 = vpack.c.bf16 %v34_v4, %v33_v2  ;;  %304 = vmatprep.mubr.msk.f32.mxu0 %vm21_vm0, %v23_v5  ;;  %v27_v7 = vld [vmem:[%s448_s0 + $0x20] sm:$0xff]  ;;  %v28_v9 = vld [vmem:[%s448_s0 + $0x28] sm:$0xff]  ;;  %v25_v10 = vld [vmem:[%s448_s0 + $0x10] sm:$0xff] }
   0x4   :  { %317 = vmatprep.subr.bf16.mxu0 %v316_v3  ;;  %324 = vmatprep.subr.bf16.mxu1 %v316_v3  ;;  %v29_v11 = vld [vmem:[%s448_s0 + $0x30] sm:$0xff]  ;;  %v26_v12 = vld [vmem:[%s448_s0 + $0x18] sm:$0xff]  ;;  %v276_v15 = vld [vmem:[%s449_s3] ss:$0 sm:$0xff] }
   0x5   :  { %319 = vmatpush3.bf16.msra.mxu0 %v316_v3  ;;  %326 = vmatpush3.bf16.msra.mxu1 %v316_v3  ;;  %v30_v13 = vld [vmem:[%s448_s0 + $0x38] sm:$0xff]  ;;  %v277_v22 = vld [vmem:[%s450_s2] ss:$0 sm:$0xff] }
   0x6   :  { %321 = vmatprep.subr.bf16.mxu0 %v320_v6  ;;  %325 = vmatprep.subr.bf16.mxu1 %v320_v6 }
   0x7   :  { %310 = vmatprep.mubr.msk.f32.mxu1 %vm21_vm0, %v27_v7 }
   0x8   :  { %v187_v16 = vld [vmem:[#allocation4] sm:$0xff] }
   0x9   :  { %323 = vmatpush3.bf16.msra.mxu0 %v320_v6  ;;  %327 = vmatpush3.bf16.msra.mxu1 %v320_v6  ;;  %v189_v21 = vmul.f32 %v276_v15, %v187_v16 }
   0xb   :  { %v190_v27 = vadd.f32 %v277_v22, %v189_v21 }
   0xc   :  { %305 = vmatmul.mubr.msk.f32.vlgmr.msra.gmra.mrb[0].mxu0 %vm21_vm0, %v24_v8  ;;  %311 = vmatmul.mubr.msk.f32.vlgmr.msra.gmra.mrb[0].mxu1 %vm21_vm0, %v28_v9 }
   0xd   :  { %307 = vmatprep.mubr.msk.f32.mxu0 %vm21_vm0, %v25_v10  ;;  %313 = vmatprep.mubr.msk.f32.mxu1 %vm21_vm0, %v29_v11 }
  0x10   :  { %308 = vmatmul.mubr.msk.f32.gmra.mrb[2].mxu0 %vm21_vm0, %v26_v12  ;;  %314 = vmatmul.mubr.msk.f32.gmra.mrb[2].mxu1 %vm21_vm0, %v30_v13 }
  0xdf   :  { %v306_v17 = vpop.f32.mrb[0].mxu0  ;;  %v312_v18 = vpop.f32.mrb[0].mxu1 }
  0xe0   :  { %166 = vst.msk [vmem:[#allocation2 + $0x8] sm:$0xff] %vm21_vm0, %v306_v17  ;;  %v126_v19 = vpop.f32.mrb[1].mxu0  ;;  %170 = vst.msk [vmem:[#allocation2 + $0x28] sm:$0xff] %vm21_vm0, %v312_v18  ;;  %v146_v20 = vpop.f32.mrb[1].mxu1 }
  0xe1   :  { %165 = vst.msk [vmem:[#allocation2] sm:$0xff] %vm21_vm0, %v126_v19  ;;  %169 = vst.msk [vmem:[#allocation2 + $0x20] sm:$0xff] %vm21_vm0, %v146_v20 }
  0xe3   :  { %v309_v23 = vpop.f32.mrb[2].mxu0  ;;  %v315_v24 = vpop.f32.mrb[2].mxu1 }
  0xe4   :  { %168 = vst.msk [vmem:[#allocation2 + $0x18] sm:$0xff] %vm21_vm0, %v309_v23  ;;  %v136_v25 = vpop.f32.mrb[3].mxu0  ;;  %172 = vst.msk [vmem:[#allocation2 + $0x38] sm:$0xff] %vm21_vm0, %v315_v24  ;;  %v156_v26 = vpop.f32.mrb[3].mxu1 }
  0xe5   :  { %167 = vst.msk [vmem:[#allocation2 + $0x10] sm:$0xff] %vm21_vm0, %v136_v25  ;;  %171 = vst.msk [vmem:[#allocation2 + $0x30] sm:$0xff] %vm21_vm0, %v156_v26 }
  0xe7   :  { %v195_v33 = vld [vmem:[#allocation2 + $0x8] sm:$0xff] }
  0xe8   :  { %v188_v28 = vld [vmem:[#allocation2] sm:$0xff]  ;;  %v228_v53 = vld [vmem:[#allocation2 + $0x28] sm:$0xff] }
  0xe9   :  { %v191_v29 = vadd.f32 %v190_v27, %v188_v28  ;;  %v221_v47 = vld [vmem:[#allocation2 + $0x20] sm:$0xff] }
  0xeb   :  { %v192_v30 = vmax.f32 %v191_v29, 0.0  ;;  %v211_v43 = vld [vmem:[#allocation2 + $0x18] sm:$0xff] }
  0xec   :  { %v204_v37 = vld [vmem:[#allocation2 + $0x10] sm:$0xff]  ;;  %v245_v63 = vld [vmem:[#allocation2 + $0x38] sm:$0xff] }
  0xed   :  { %v196_v31 = vmul.f32 %v276_v15, %v192_v30  ;;  %200 = vst.msk [vmem:[%s451_s4] sm:$0xff] %vm21_vm0, %v192_v30  ;;  %v238_v57 = vld [vmem:[#allocation2 + $0x30] sm:$0xff] }
  0xef   :  { %v197_v32 = vadd.f32 %v277_v22, %v196_v31 }
  0xf1   :  { %v198_v34 = vadd.f32 %v197_v32, %v195_v33 }
  0xf3   :  { %v199_v35 = vmax.f32 %v198_v34, 0.0 }
  0xf5   :  { %201 = vst.msk [vmem:[%s451_s4 + $0x8] sm:$0xff] %vm21_vm0, %v199_v35  ;;  %v205_v36 = vmul.f32 %v276_v15, %v199_v35 }
  0xf7   :  { %v206_v38 = vadd.f32 %v277_v22, %v205_v36 }
  0xf9   :  { %v207_v39 = vadd.f32 %v206_v38, %v204_v37 }
  0xfb   :  { %v208_v40 = vmax.f32 %v207_v39, 0.0 }
  0xfd   :  { %v212_v41 = vmul.f32 %v276_v15, %v208_v40  ;;  %278 = vst.msk [vmem:[%s451_s4 + $0x10] sm:$0xff] %vm21_vm0, %v208_v40 }
  0xff   :  { %v213_v42 = vadd.f32 %v277_v22, %v212_v41 }
 0x101   :  { %v214_v44 = vadd.f32 %v213_v42, %v211_v43 }
 0x103   :  { %v215_v45 = vmax.f32 %v214_v44, 0.0 }
 0x105   :  { %279 = vst.msk [vmem:[%s451_s4 + $0x18] sm:$0xff] %vm21_vm0, %v215_v45  ;;  %v222_v46 = vmul.f32 %v276_v15, %v215_v45 }
 0x107   :  { %v223_v48 = vadd.f32 %v277_v22, %v222_v46 }
 0x109   :  { %v224_v49 = vadd.f32 %v223_v48, %v221_v47 }
 0x10b   :  { %v225_v50 = vmax.f32 %v224_v49, 0.0 }
 0x10d   :  { %v229_v51 = vmul.f32 %v276_v15, %v225_v50  ;;  %280 = vst.msk [vmem:[%s451_s4 + $0x20] sm:$0xff] %vm21_vm0, %v225_v50 }
 0x10f   :  { %v230_v52 = vadd.f32 %v277_v22, %v229_v51 }
 0x111   :  { %v231_v54 = vadd.f32 %v230_v52, %v228_v53 }
 0x113   :  { %v232_v55 = vmax.f32 %v231_v54, 0.0 }
 0x115   :  { %281 = vst.msk [vmem:[%s451_s4 + $0x28] sm:$0xff] %vm21_vm0, %v232_v55  ;;  %v239_v56 = vmul.f32 %v276_v15, %v232_v55 }
 0x117   :  { %v240_v58 = vadd.f32 %v277_v22, %v239_v56 }
 0x119   :  { %v241_v59 = vadd.f32 %v240_v58, %v238_v57 }
 0x11b   :  { %v242_v60 = vmax.f32 %v241_v59, 0.0 }
 0x11d   :  { %v246_v61 = vmul.f32 %v276_v15, %v242_v60  ;;  %282 = vst.msk [vmem:[%s451_s4 + $0x30] sm:$0xff] %vm21_vm0, %v242_v60 }
 0x11f   :  { %v247_v62 = vadd.f32 %v277_v22, %v246_v61 }
 0x121   :  { %v248_v0 = vadd.f32 %v247_v62, %v245_v63 }
 0x123   :  { %v249_v1 = vmax.f32 %v248_v0, 0.0 }
 0x125   :  { %283 = vst.msk [vmem:[%s451_s4 + $0x38] sm:$0xff] %vm21_vm0, %v249_v1  ;;  %253 = vst.msk [vmem:[#allocation4] sm:$0xff] %vm21_vm0, %v249_v1 }

</bundles_post_ra>
